<compile_context>
chip_gen: v7x
topology: tpu7x:2x2x1
jax: 0.10.0
libtpu: 0.0.40
codegen_flags: <defaults>
</compile_context>

<pallas_src>
import jax
import jax.numpy as jnp
from jax.experimental import pallas as pl
from jax.experimental.pallas import tpu as pltpu


def _complex_dropout2d_kernel(mask_ref, x_ref, o_ref):
    # mask_ref: (tile_r, 1) float32, already contains keep/(1-p)
    # x_ref/o_ref: (tile_r, tile_c) float32, re/im interleaved along lanes.
    o_ref[...] = x_ref[...] * mask_ref[...]


def _choose_tiles(rows, cols, *, target_bytes=4 * 1024 * 1024, max_tile_c=8192):
    """Pick a (tile_r, tile_c) f32 block of ~target_bytes, bounded independently
    of H*W so huge feature maps never exceed scoped/physical VMEM."""
    target_elems = max(1, target_bytes // 4)

    # Lane axis: take the full width when small (a full-extent block dim is
    # always legal, even if < 128 -> only cost is masked stores on tiny maps);
    # otherwise cap at a multiple of 128 and let the last block be partial.
    if cols <= max_tile_c:
        tile_c = cols
    else:
        tile_c = max_tile_c  # multiple of 128; partial last block is OOB-masked

    # Sublane axis: fill the remaining budget in multiples of 8.
    tr = max(1, target_elems // tile_c)
    if tr >= rows:
        tile_r = rows  # full axis is always a legal block dim
    else:
        tile_r = min(max(8, (tr // 8) * 8), rows)

    # Prefer >=2 row blocks so both v7x TensorCores get work on mid-size inputs.
    if rows >= 16 and pl.cdiv(rows, tile_r) * pl.cdiv(cols, tile_c) < 2:
        tile_r = max(8, ((rows // 2) // 8) * 8)

    return tile_r, tile_c


def complex_dropout2d_packed(x_packed, mask):
    """Dropout2d on the packed layout.

    x_packed: (rows, cols) float32 with rows = N*C and cols = 2*H*W
              (re/im interleaved along the lane axis, i.e. the raw complex64
              byte layout).
    mask:     (rows, 1) float32 containing keep/(1-p) per (sample, channel).
    """
    rows, cols = x_packed.shape
    tile_r, tile_c = _choose_tiles(rows, cols)
    grid = (pl.cdiv(rows, tile_r), pl.cdiv(cols, tile_c))

    x_spec = pl.BlockSpec((tile_r, tile_c), lambda i, j: (i, j))
    m_spec = pl.BlockSpec((tile_r, 1), lambda i, j: (i, 0))

    return pl.pallas_call(
        _complex_dropout2d_kernel,
        out_shape=jax.ShapeDtypeStruct((rows, cols), jnp.float32),
        grid=grid,
        in_specs=[m_spec, x_spec],
        out_specs=x_spec,
        input_output_aliases={1: 0},  # reuse packed input buffer for output
        compiler_params=pltpu.CompilerParams(
            dimension_semantics=("parallel", "parallel"),
            vmem_limit_bytes=32 * 1024 * 1024,  # covers 2x(in)+2x(out) 4 MiB blocks
        ),
        cost_estimate=pl.CostEstimate(
            flops=rows * cols,
            transcendentals=0,
            bytes_accessed=2 * rows * cols * 4 + rows * 4,
        ),
    )(mask, x_packed)


def complex_dropout2d(x, p, key, training=True):
    """Forward of ComplexDropout2d (drop-in, complex64 in / complex64 out).

    x: complex64 array of shape (N, C, H, W).  p and training must be static
    Python values (they gate Python-level branches).
    """
    if (not training) or p == 0.0:
        return x
    if p >= 1.0:
        # PyTorch Dropout2d with p=1 zeroes everything (avoid 0/0 -> NaN).
        return jnp.zeros_like(x)

    N, C, H, W = x.shape
    rows = N * C
    cols = 2 * H * W  # interleaved re/im along the lane axis

    # Per-(sample, channel) Bernoulli keep mask, identical for real & imag.
    keep = jax.random.bernoulli(key, 1.0 - p, (rows,))
    mask = (keep.astype(jnp.float32) / jnp.float32(1.0 - p)).reshape(rows, 1)

    # TODO(synk): XLA's bitcast_convert_type rejects complex operands, so a
    # zero-copy complex64<->f32 reinterpret is unavailable; the pack/unpack
    # below each add an HBM read+write pass outside the kernel.  Callers that
    # can keep activations in the packed layout should use
    # complex_dropout2d_packed directly.
    xf = jnp.stack([jnp.real(x), jnp.imag(x)], axis=-1).astype(jnp.float32)
    xf = xf.reshape(rows, cols)

    yf = complex_dropout2d_packed(xf, mask)

    y = yf.reshape(N, C, H, W, 2)
    return jax.lax.complex(y[..., 0], y[..., 1]).astype(x.dtype)


if __name__ == "__main__":
    key = jax.random.PRNGKey(0)
    k_re, k_im, k_drop = jax.random.split(key, 3)

    N, C, H, W = 2, 4, 16, 16
    p = 0.5

    x_re = jax.random.normal(k_re, (N, C, H, W), dtype=jnp.float32)
    x_im = jax.random.normal(k_im, (N, C, H, W), dtype=jnp.float32)
    x = (x_re + 1j * x_im).astype(jnp.complex64)

    out = complex_dropout2d(x, p, k_drop, training=True)
    out = jax.block_until_ready(out)

    # Reference check (same mask, plain JAX) to validate kernel semantics.
    keep = jax.random.bernoulli(k_drop, 1.0 - p, (N * C,))
    scale = (keep.astype(jnp.float32) / (1.0 - p)).reshape(N, C, 1, 1)
    ref = x * scale.astype(jnp.complex64)
    assert jnp.allclose(out, ref, atol=1e-6), "mismatch vs reference"
    assert out.shape == x.shape and out.dtype == x.dtype

    # Eval mode / p>=1 sanity checks.
    assert jnp.array_equal(complex_dropout2d(x, p, k_drop, training=False), x)
    assert jnp.all(complex_dropout2d(x, 1.0, k_drop, training=True) == 0)

    print("KERNEL_OK")
</pallas_src>

<mosaic_0001>
module attributes {stable_mosaic.version = 11 : i64} {
  func.func @_complex_dropout2d_kernel(%arg0: i32, %arg1: i32, %arg2: memref<8x1xf32, #tpu.memory_space<vmem>>, %arg3: memref<8x512xf32, #tpu.memory_space<vmem>>, %arg4: memref<8x512xf32, #tpu.memory_space<vmem>>) attributes {dimension_semantics = [#tpu.dimension_semantics<parallel>, #tpu.dimension_semantics<parallel>], iteration_bounds = array<i64: 1, 1>, scalar_prefetch = 0 : i64, scratch_operands = 0 : i64, tpu.core_type = #tpu.core_type<tc>, window_params = [{transform_indices = @transform_0, window_bounds = array<i64: 8, 1>}, {transform_indices = @transform_1, window_bounds = array<i64: 8, 512>}, {transform_indices = @transform_2, window_bounds = array<i64: 8, 512>}]} {
    %c0 = arith.constant 0 : index
    %c0_0 = arith.constant 0 : index
    %0 = vector.load %arg3[%c0, %c0_0] : memref<8x512xf32, #tpu.memory_space<vmem>>, vector<8x512xf32>
    %c0_1 = arith.constant 0 : index
    %c0_2 = arith.constant 0 : index
    %1 = vector.load %arg2[%c0_1, %c0_2] : memref<8x1xf32, #tpu.memory_space<vmem>>, vector<8x1xf32>
    %2 = vector.broadcast %1 : vector<8x1xf32> to vector<8x512xf32>
    %3 = arith.mulf %0, %2 : vector<8x512xf32>
    %c0_3 = arith.constant 0 : index
    %c0_4 = arith.constant 0 : index
    %4 = vector.load %arg4[%c0_3, %c0_4] : memref<8x512xf32, #tpu.memory_space<vmem>>, vector<8x512xf32>
    tpu.vector_store %arg4[%c0_3, %c0_4], %3 {strides = array<i32>} : memref<8x512xf32, #tpu.memory_space<vmem>>, vector<8x512xf32>,
    return
  }
  func.func @transform_0(%arg0: i32, %arg1: i32) -> (i32, i32) {
    %c0_i32 = arith.constant 0 : i32
    %c0_i32_0 = arith.constant 0 : i32
    return %arg0, %c0_i32 : i32, i32
  }
  func.func @transform_1(%arg0: i32, %arg1: i32) -> (i32, i32) {
    %c0_i32 = arith.constant 0 : i32
    return %arg0, %arg1 : i32, i32
  }
  func.func @transform_2(%arg0: i32, %arg1: i32) -> (i32, i32) {
    %c0_i32 = arith.constant 0 : i32
    return %arg0, %arg1 : i32, i32
  }
}

</mosaic_0001>

<bundles_post_ra>
// kernel: tpu_custom_call.1
= control target key start
LH: loop header
LB: loop body
LE: loop exit
PB: predicated region body
PF: predicated region fallthrough
CT: control target
= control target key end

     0   :  { %7 = vsyncpa [#allocation3], 0  ;;  %s154_s0 = inlined_call_operand.vmem [shape: f32[8,1], index: 0, kind: input, shape index: {}]   ;;  %s155_s1 = inlined_call_operand.hbm [shape: f32[8,512], index: 1, kind: input, shape index: {}, may-alias: {1,2}]   ;;  %s156_s2 = inlined_call_operand.hbm [shape: f32[8,512], index: 2, kind: output, shape index: {}, may-alias: {1,2}]  }
   0x1   :  { %8 = vsyncpa [#allocation4], 0  ;;  %s109_s9 = smov [#allocation2]   ;;  %s61_s13 = scalar_lea.hbm %s155_s1, 512 }
   0x2   :  { %s17_s10 = sshll.u32 %s109_s9, 4  ;;  %p62_p0 = scmp.ne.s32.totalorder %s155_s1, %s61_s13  ;;  %s18_s10 = int_to_ptr.vmem [resolvable:$true] %s17_s10 }
   0x3   :  { %p65_p1 = scmp.lt.u32.totalorder %s61_s13, %s155_s1 }
   0x5   :  { %p67_p2 = pnand %p65_p1, %p62_p0 }
   0x7   :  { %70 = shalt.err (!%p67_p2)
}
   0x8   :  { %s71_s18 = scalar_lea.vmem %s18_s10, 512  ;;  %p76_p4 = scmp.lt.s32.totalorder %s18_s10, %s18_s10 }
   0x9   :  { %p72_p3 = scmp.ne.s32.totalorder %s18_s10, %s71_s18  ;;  %p77_p5 = scmp.lt.s32.totalorder %s71_s18, %s71_s18 }
   0xb   :  { %p78_p6 = por %p77_p5, %p76_p4 }
   0xd   :  { %p79_p7 = pnand %p78_p6, %p72_p3 }
   0xf   :  { %82 = shalt.err (!%p79_p7)
}
  0x10   :  { %20 = dma.hbm_to_vmem [thread:$0]  %s155_s1, 512, %s18_s10, [#allocation3]  }
  0x11   :  { %105 = dma.done.wait [#allocation3], 512  }
  0x12   :  { %106 = vsyncadd [#allocation3], 4294966784  ;;  %v110_v0 = vmov 0   ;;  %v28_v1 = vld [vmem:[%s154_s0] sm:$0xff]  ;;  %v25_v3 = vld [vmem:[#allocation2 + $0x8] sm:$0xff]  ;;  %s111_s23 = smov [#allocation5]  }
  0x13   :  { %60 = vset.pattern.permute.xlu0 %v110_v0  ;;  %v24_v2 = vld [vmem:[#allocation2] sm:$0xff]  ;;  %v26_v4 = vld [vmem:[#allocation2 + $0x10] sm:$0xff]  ;;  %v27_v5 = vld [vmem:[#allocation2 + $0x18] sm:$0xff]  ;;  %s48_s24 = sshll.u32 %s111_s23, 4  ;;  %s49_s24 = int_to_ptr.vmem [resolvable:$true] %s48_s24 }
  0x14   :  { %31 = vperm.xlu0 %60, %v28_v1   ;;  %s83_s1 = scalar_lea.vmem %s49_s24, 512  ;;  %p88_p9 = scmp.lt.s32.totalorder %s49_s24, %s49_s24 }
  0x15   :  { %p84_p8 = scmp.ne.s32.totalorder %s49_s24, %s83_s1  ;;  %p89_p10 = scmp.lt.s32.totalorder %s83_s1, %s83_s1 }
  0x17   :  { %p90_p11 = por %p89_p10, %p88_p9 }
  0x19   :  { %p91_p12 = pnand %p90_p11, %p84_p8 }
  0x93   :  { %v32_v6 = vpop.permute.xlu0 %31 }
  0x94   :  { %v34_v7 = vmul.f32 %v32_v6, %v24_v2  ;;  %v35_v8 = vmul.f32 %v32_v6, %v25_v3  ;;  %v36_v9 = vmul.f32 %v32_v6, %v26_v4  ;;  %v37_v10 = vmul.f32 %v32_v6, %v27_v5 }
  0x96   :  { %38 = vst [vmem:[#allocation5] sm:$0xff] %v34_v7  ;;  %39 = vst [vmem:[#allocation5 + $0x8] sm:$0xff] %v35_v8 }
  0x97   :  { %40 = vst [vmem:[#allocation5 + $0x10] sm:$0xff] %v36_v9  ;;  %41 = vst [vmem:[#allocation5 + $0x18] sm:$0xff] %v37_v10 }
  0x98   :  { %94 = shalt.err (!%p91_p12)
}
  0x99   :  { %s95_s26 = scalar_lea.hbm %s156_s2, 512 }
  0x9a   :  { %p96_p13 = scmp.ne.s32.totalorder %s156_s2, %s95_s26  ;;  %p99_p0 = scmp.lt.u32.totalorder %s95_s26, %s156_s2 }
  0x9c   :  { %p101_p1 = pnand %p99_p0, %p96_p13 }
  0x9e   :  { %104 = shalt.err (!%p101_p1)
}
  0x9f   :  { %51 = dma.vmem_to_hbm [thread:$0]  %s49_s24, 512, %s156_s2, [#allocation4]  }
  0xa0   :  { %107 = dma.done.wait [#allocation4], 512  }
  0xa1   :  { %108 = vsyncadd [#allocation4], 4294966784 }
  0xa2   :  { %55 = vsyncpa [#allocation3], 1 }
  0xa3   :  { %56 = vsyncpa [#allocation4], 1 }

</bundles_post_ra>
